<compile_context>
chip_gen: v7x
topology: tpu7x:2x2x1
jax: 0.10.0
libtpu: 0.0.40
codegen_flags: <defaults>
</compile_context>

<pallas_src>
import jax
import jax.numpy as jnp
from jax.experimental import pallas as pl
from jax.experimental.pallas import tpu as pltpu


def _projected_adaptor_kernel(sv_ref, p1_ref, p2_ref, x_ref, w_ref, out_ref,
                              proj_ref):
    """Grid step (g, i, j): vocab group g (megacore split), row tile i,
    vocab tile j inside the group (innermost, sequential).

    sv_ref:   (TM, Sr)   per-row switch values (epsilon already folded in)
    p1_ref:   (Sr, D)    projector1 stacked lane-dense: p1s[s*r+k, d] = P1[s, d, k]
    p2_ref:   (Sr, D)    projector2 stacked lane-dense: p2s[s*r+k, e] = P2[s, e, k]
    x_ref:    (TM, D)    hidden-state rows
    w_ref:    (TV, D)    lm_head weight rows (vocab tile, NOT transposed)
    out_ref:  (TM, TV)   logits tile
    proj_ref: (TM, D)    scratch in the lm_head dtype: projected rows, cached
                         across the vocab axis of the current (g, i).
    """
    # Compute the projected rows once per (group, row tile); reuse them for
    # every vocab tile.  Low-rank path: the (D, D) projector is never built.
    @pl.when(pl.program_id(2) == 0)
    def _():
        x = x_ref[...]
        # (TM, D) x (Sr, D) contracting D -> (TM, Sr); f32 MXU accumulation.
        t = jax.lax.dot_general(x, p1_ref[...], (((1,), (1,)), ((), ())),
                                preferred_element_type=jnp.float32)
        t = t * sv_ref[...]                      # epsilon * switch value per row
        # (TM, Sr) x (Sr, D) -> (TM, D)
        adj = jax.lax.dot_general(t.astype(p2_ref.dtype), p2_ref[...],
                                  (((1,), (0,)), ((), ())),
                                  preferred_element_type=jnp.float32)
        # Store once in the matmul input dtype (no per-vocab-step casts).
        proj_ref[...] = (x.astype(jnp.float32) + adj).astype(proj_ref.dtype)

    # logits tile: (TM, D) x (TV, D) contracting D -> (TM, TV).  Transposed-RHS
    # dimension numbers are the same pattern the reference flash-attention
    # kernels use; no wrapper-side transpose of the big lm_head weight.
    out_ref[...] = jax.lax.dot_general(
        proj_ref[...], w_ref[...], (((1,), (1,)), ((), ())),
        preferred_element_type=jnp.float32).astype(out_ref.dtype)


def _round_up(x, m):
    return ((x + m - 1) // m) * m


def projected_adaptor_forward(state, switch_values, projector1, projector2,
                              lm_head_weight, *, epsilon):
    """state (B, L, D); switch_values (B, S); projector* (S, D, r);
    lm_head_weight (V, D).  Returns logits (B, L, V)."""
    B, L, D = state.shape
    V = lm_head_weight.shape[0]
    S, _, r = projector1.shape
    Sr = S * r
    n_rows = B * L

    # ---- tiny wrapper-side re-layouts (projectors / switch values only) ----
    # Lane-dense (Sr, D) stacking; epsilon folded into the per-row scales so
    # the kernel computes  proj = x + ((x @ p1s^T) * sv) @ p2s .
    p1s = jnp.transpose(projector1, (0, 2, 1)).reshape(Sr, D)          # (Sr, D)
    p2s = jnp.transpose(projector2, (0, 2, 1)).reshape(Sr, D)          # (Sr, D)
    sv_rows = jnp.repeat(switch_values.astype(jnp.float32), r, axis=1)
    sv_rows = sv_rows * jnp.float32(epsilon)                            # (B, Sr)
    sv_rows = jnp.broadcast_to(sv_rows[:, None, :],
                               (B, L, Sr)).reshape(n_rows, Sr)          # (B*L, Sr)
    x2d = state.reshape(n_rows, D)

    compute_dtype = lm_head_weight.dtype       # dtype fed to the big MXU matmul
    x_it = state.dtype.itemsize
    w_it = lm_head_weight.dtype.itemsize
    o_it = state.dtype.itemsize
    c_it = jnp.dtype(compute_dtype).itemsize
    p_it = projector1.dtype.itemsize

    # ---- tile selection against an explicit VMEM budget --------------------
    TM = min(512, _round_up(n_rows, 8))        # row tile (MXU M dim)
    TV = min(1024, _round_up(V, 128))          # vocab tile, lane-dense stores

    def footprint(tm, tv):
        b = 2 * tv * D * w_it                  # lm_head tiles (double-buffered)
        b += 2 * tm * D * x_it                 # state rows
        b += 2 * tm * tv * o_it                # logits tiles
        b += tm * D * c_it                     # projected-row scratch
        b += 2 * tm * max(Sr, 128) * 4         # switch values (lane-padded)
        b += 4 * _round_up(Sr, 8) * D * p_it   # p1s + p2s
        return b

    VMEM_BUDGET = 44 * 1024 * 1024             # safe for v7x's 64 MiB physical VMEM
    while footprint(TM, TV) > VMEM_BUDGET and TV > 128:
        TV = max(128, TV // 2)
    while footprint(TM, TV) > VMEM_BUDGET and TM > 8:
        TM = max(8, _round_up(TM // 2, 8))

    Mpad = _round_up(n_rows, TM)
    n_row_tiles = Mpad // TM
    n_vtiles = pl.cdiv(V, TV)
    # Decode-shaped inputs (single row tile): give v7x's second TensorCore its
    # own half of the vocab via a leading "parallel" group axis.
    G = 2 if (n_row_tiles == 1 and n_vtiles >= 2) else 1
    Vpad = _round_up(V, G * TV)
    vpg = Vpad // (G * TV)                     # vocab tiles per group

    # ---- zero-pad ragged edges (padded rows/cols produce zeros, sliced off) -
    if Mpad != n_rows:
        x2d = jnp.pad(x2d, ((0, Mpad - n_rows), (0, 0)))
        sv_rows = jnp.pad(sv_rows, ((0, Mpad - n_rows), (0, 0)))
    w = lm_head_weight
    if Vpad != V:
        w = jnp.pad(w, ((0, Vpad - V), (0, 0)))

    grid_spec = pltpu.PrefetchScalarGridSpec(
        num_scalar_prefetch=0,
        grid=(G, n_row_tiles, vpg),
        in_specs=[
            pl.BlockSpec((TM, Sr), lambda g, i, j: (i, 0)),           # switch values
            pl.BlockSpec((Sr, D), lambda g, i, j: (0, 0)),            # projector1 stacked
            pl.BlockSpec((Sr, D), lambda g, i, j: (0, 0)),            # projector2 stacked
            pl.BlockSpec((TM, D), lambda g, i, j: (i, 0)),            # state rows
            pl.BlockSpec((TV, D), lambda g, i, j: (g * vpg + j, 0)),  # lm_head rows
        ],
        out_specs=pl.BlockSpec((TM, TV), lambda g, i, j: (i, g * vpg + j)),
        scratch_shapes=[pltpu.VMEM((TM, D), compute_dtype)],
    )

    # HBM traffic: the lm_head weight is re-streamed once per row tile.
    cost = pl.CostEstimate(
        flops=2 * Mpad * D * Vpad + 4 * Mpad * D * Sr,
        transcendentals=0,
        bytes_accessed=int(n_row_tiles * Vpad * D * w_it
                           + G * Mpad * D * x_it
                           + Mpad * Vpad * o_it),
    )

    vmem_limit = int(min(56 * 1024 * 1024,
                         max(32 * 1024 * 1024,
                             footprint(TM, TV) + 8 * 1024 * 1024)))

    out2d = pl.pallas_call(
        _projected_adaptor_kernel,
        out_shape=jax.ShapeDtypeStruct((Mpad, Vpad), state.dtype),
        grid_spec=grid_spec,
        compiler_params=pltpu.CompilerParams(
            dimension_semantics=("parallel", "parallel", "arbitrary"),
            vmem_limit_bytes=vmem_limit),
        cost_estimate=cost,
    )(sv_rows, p1s, p2s, x2d, w)

    return out2d[:n_rows, :V].reshape(B, L, V)


def _reference(state, switch_values, projector1, projector2, w, epsilon):
    # Pure-JAX reference of the PyTorch forward.
    M = jnp.einsum("sdr,ser->sde", projector1, projector2)        # (S, D, D)
    P = jnp.einsum("bs,sde->bde", switch_values, M)               # (B, D, D)
    proj_state = state + epsilon * jnp.einsum("bld,bde->ble", state, P)
    return jnp.einsum("bld,vd->blv", proj_state, w)               # (B, L, V)


if __name__ == "__main__":
    epsilon = 0.01
    init_var = 0.1
    key = jax.random.PRNGKey(0)

    # (B, L, D, V, S, r): base case, a decode-like multi-vocab-tile case that
    # exercises the G=2 group axis, and a ragged case exercising row/vocab
    # padding with Sr not a multiple of 8.
    configs = [
        (2, 8, 32, 128, 2, 4),
        (1, 8, 32, 2048, 2, 4),
        (2, 9, 32, 200, 3, 2),
    ]

    for (B, L, D, V, S, r) in configs:
        key, k1, k2, k3, k4, k5 = jax.random.split(key, 6)
        projector1 = jax.random.normal(k1, (S, D, r), jnp.float32) * init_var
        projector2 = jax.random.normal(k2, (S, D, r), jnp.float32) * init_var
        lm_head_weight = jax.random.normal(k3, (V, D), jnp.float32) * 0.02
        state = jax.random.normal(k4, (B, L, D), jnp.float32)
        switch_values = jax.random.normal(k5, (B, S), jnp.float32)  # set_value(...)

        logits = projected_adaptor_forward(state, switch_values, projector1,
                                           projector2, lm_head_weight,
                                           epsilon=epsilon)
        logits = jax.block_until_ready(logits)

        ref = _reference(state, switch_values, projector1, projector2,
                         lm_head_weight, epsilon)
        assert logits.shape == (B, L, V) and logits.dtype == jnp.float32
        assert jnp.allclose(logits, ref, atol=1e-4, rtol=1e-4), (
            (B, L, D, V, S, r), float(jnp.max(jnp.abs(logits - ref))))

    print("KERNEL_OK")
</pallas_src>

<mosaic_0001>
module attributes {stable_mosaic.version = 11 : i64} {
  func.func @_projected_adaptor_kernel(%arg0: i32, %arg1: i32, %arg2: i32, %arg3: memref<16x8xf32, #tpu.memory_space<vmem>>, %arg4: memref<8x32xf32, #tpu.memory_space<vmem>>, %arg5: memref<8x32xf32, #tpu.memory_space<vmem>>, %arg6: memref<16x32xf32, #tpu.memory_space<vmem>>, %arg7: memref<128x32xf32, #tpu.memory_space<vmem>>, %arg8: memref<16x128xf32, #tpu.memory_space<vmem>>, %arg9: memref<16x32xf32, #tpu.memory_space<vmem>>) attributes {dimension_semantics = [#tpu.dimension_semantics<parallel>, #tpu.dimension_semantics<parallel>, #tpu.dimension_semantics<arbitrary>], iteration_bounds = array<i64: 1, 1, 1>, scalar_prefetch = 0 : i64, scratch_operands = 1 : i64, tpu.core_type = #tpu.core_type<tc>, window_params = [{transform_indices = @transform_0, window_bounds = array<i64: 16, 8>}, {pipeline_mode = #tpu.pipeline_mode<synchronous>, transform_indices = @transform_1, window_bounds = array<i64: 8, 32>}, {pipeline_mode = #tpu.pipeline_mode<synchronous>, transform_indices = @transform_2, window_bounds = array<i64: 8, 32>}, {transform_indices = @transform_3, window_bounds = array<i64: 16, 32>}, {transform_indices = @transform_4, window_bounds = array<i64: 128, 32>}, {transform_indices = @transform_5, window_bounds = array<i64: 16, 128>}]} {
    %c0_i32 = arith.constant 0 : i32
    %0 = arith.cmpi eq, %arg2, %c0_i32 : i32
    %1 = arith.extui %0 : i1 to i32
    %c0_i32_0 = arith.constant 0 : i32
    %2 = arith.cmpi ne, %1, %c0_i32_0 : i32
    scf.if %2 {
      %c0_6 = arith.constant 0 : index
      %c0_7 = arith.constant 0 : index
      %7 = vector.load %arg6[%c0_6, %c0_7] : memref<16x32xf32, #tpu.memory_space<vmem>>, vector<16x32xf32>
      %c0_8 = arith.constant 0 : index
      %c0_9 = arith.constant 0 : index
      %8 = vector.load %arg4[%c0_8, %c0_9] : memref<8x32xf32, #tpu.memory_space<vmem>>, vector<8x32xf32>
      %cst_10 = arith.constant dense<0.000000e+00> : vector<16x8xf32>
      %9 = tpu.matmul %7, %8, %cst_10 {dimension_numbers = #tpu.dot_dimension_numbers<[1], [1], [0], [0], [0, 0, 1, 0], [], []>} : vector<16x32xf32>, vector<8x32xf32>, vector<16x8xf32> -> vector<16x8xf32>
      %c0_11 = arith.constant 0 : index
      %c0_12 = arith.constant 0 : index
      %10 = vector.load %arg3[%c0_11, %c0_12] : memref<16x8xf32, #tpu.memory_space<vmem>>, vector<16x8xf32>
      %11 = arith.mulf %9, %10 : vector<16x8xf32>
      %c0_13 = arith.constant 0 : index
      %c0_14 = arith.constant 0 : index
      %12 = vector.load %arg5[%c0_13, %c0_14] : memref<8x32xf32, #tpu.memory_space<vmem>>, vector<8x32xf32>
      %cst_15 = arith.constant dense<0.000000e+00> : vector<16x32xf32>
      %13 = tpu.matmul %11, %12, %cst_15 {dimension_numbers = #tpu.dot_dimension_numbers<[1], [0], [0], [1], [0, 0, 1, 1], [], []>} : vector<16x8xf32>, vector<8x32xf32>, vector<16x32xf32> -> vector<16x32xf32>
      %14 = arith.addf %7, %13 : vector<16x32xf32>
      %c0_16 = arith.constant 0 : index
      %c0_17 = arith.constant 0 : index
      %15 = vector.load %arg9[%c0_16, %c0_17] : memref<16x32xf32, #tpu.memory_space<vmem>>, vector<16x32xf32>
      tpu.vector_store %arg9[%c0_16, %c0_17], %14 {strides = array<i32>} : memref<16x32xf32, #tpu.memory_space<vmem>>, vector<16x32xf32>,
    } else {
    }
    %c0 = arith.constant 0 : index
    %c0_1 = arith.constant 0 : index
    %3 = vector.load %arg9[%c0, %c0_1] : memref<16x32xf32, #tpu.memory_space<vmem>>, vector<16x32xf32>
    %c0_2 = arith.constant 0 : index
    %c0_3 = arith.constant 0 : index
    %4 = vector.load %arg7[%c0_2, %c0_3] : memref<128x32xf32, #tpu.memory_space<vmem>>, vector<128x32xf32>
    %cst = arith.constant dense<0.000000e+00> : vector<16x128xf32>
    %5 = tpu.matmul %3, %4, %cst {dimension_numbers = #tpu.dot_dimension_numbers<[1], [1], [0], [0], [0, 0, 1, 0], [], []>} : vector<16x32xf32>, vector<128x32xf32>, vector<16x128xf32> -> vector<16x128xf32>
    %c0_4 = arith.constant 0 : index
    %c0_5 = arith.constant 0 : index
    %6 = vector.load %arg8[%c0_4, %c0_5] : memref<16x128xf32, #tpu.memory_space<vmem>>, vector<16x128xf32>
    tpu.vector_store %arg8[%c0_4, %c0_5], %5 {strides = array<i32>} : memref<16x128xf32, #tpu.memory_space<vmem>>, vector<16x128xf32>,
    return
  }
  func.func @transform_0(%arg0: i32, %arg1: i32, %arg2: i32) -> (i32, i32) {
    %c0_i32 = arith.constant 0 : i32
    %c0_i32_0 = arith.constant 0 : i32
    return %arg1, %c0_i32 : i32, i32
  }
  func.func @transform_1(%arg0: i32, %arg1: i32, %arg2: i32) -> (i32, i32) {
    %c0_i32 = arith.constant 0 : i32
    %c0_i32_0 = arith.constant 0 : i32
    %c0_i32_1 = arith.constant 0 : i32
    return %c0_i32, %c0_i32_0 : i32, i32
  }
  func.func @transform_2(%arg0: i32, %arg1: i32, %arg2: i32) -> (i32, i32) {
    %c0_i32 = arith.constant 0 : i32
    %c0_i32_0 = arith.constant 0 : i32
    %c0_i32_1 = arith.constant 0 : i32
    return %c0_i32, %c0_i32_0 : i32, i32
  }
  func.func @transform_3(%arg0: i32, %arg1: i32, %arg2: i32) -> (i32, i32) {
    %c0_i32 = arith.constant 0 : i32
    %c0_i32_0 = arith.constant 0 : i32
    return %arg1, %c0_i32 : i32, i32
  }
  func.func @transform_4(%arg0: i32, %arg1: i32, %arg2: i32) -> (i32, i32) {
    %c1_i32 = arith.constant 1 : i32
    %0 = arith.muli %arg0, %c1_i32 : i32
    %1 = arith.addi %0, %arg2 : i32
    %c0_i32 = arith.constant 0 : i32
    %c0_i32_0 = arith.constant 0 : i32
    return %1, %c0_i32 : i32, i32
  }
  func.func @transform_5(%arg0: i32, %arg1: i32, %arg2: i32) -> (i32, i32) {
    %c1_i32 = arith.constant 1 : i32
    %0 = arith.muli %arg0, %c1_i32 : i32
    %1 = arith.addi %0, %arg2 : i32
    %c0_i32 = arith.constant 0 : i32
    return %arg1, %1 : i32, i32
  }
}

</mosaic_0001>

<bundles_post_ra>
// kernel: tpu_custom_call.1
= control target key start
LH: loop header
LB: loop body
LE: loop exit
PB: predicated region body
PF: predicated region fallthrough
CT: control target
= control target key end

     0   :  { %vm51_vm0 = vcmask 261120   ;;  %s730_s0 = inlined_call_operand.vmem [shape: f32[16,8], index: 0, kind: input, shape index: {}]   ;;  %s731_s1 = inlined_call_operand.vmem [shape: f32[8,32], index: 1, kind: input, shape index: {}]   ;;  %s732_s2 = inlined_call_operand.vmem [shape: f32[8,32], index: 2, kind: input, shape index: {}]   ;;  %s733_s3 = inlined_call_operand.vmem [shape: f32[16,32], index: 3, kind: input, shape index: {}]   ;;  %s734_s4 = inlined_call_operand.vmem [shape: f32[128,32], index: 4, kind: input, shape index: {}]   ;;  %s735_s5 = inlined_call_operand.hbm [shape: f32[16,128], index: 5, kind: output, shape index: {}]  }
   0x1   :  { %v50_v0 = vld [vmem:[%s731_s1] sm:$0xff]  ;;  %v49_v2 = vld [vmem:[%s733_s3 + $0x8] sm:$0xff] }
   0x2   :  { %v608_v1 = vld [vmem:[%s733_s3] sm:$0xff]  ;;  %449 = vmatprep.subr.msk.mxu0 %vm51_vm0, %v50_v0 }
   0x3   :  { %451 = vmatprep.mubr.msk.f32.mxu0 %vm51_vm0, %v608_v1  ;;  %450 = vmatpush3.xpose.msk.msra.mxu0 %vm51_vm0, %v50_v0 }
   0x4   :  { %10 = vsyncpa [#allocation4], 0  ;;  %v140_v3 = vld [vmem:[%s732_s2] sm:$0xff]  ;;  %v230_v6 = vld [vmem:[%s734_s4 + $0x8] sm:$0xff]  ;;  %vm141_vm2 = vcmask 64512  }
   0x5   :  { %454 = vmatprep.subr.mxu0 %v140_v3  ;;  %vm623_vm1 = vmpackc.low %vm51_vm0, %vm51_vm0  ;;  %v229_v5 = vld [vmem:[%s734_s4] sm:$0xff]  ;;  %v231_v7 = vld [vmem:[%s734_s4 + $0x10] sm:$0xff] }
   0x6   :  { %452 = vmatmul.mubr.msk.f32.vlgmr.msra.gmra.mrb[0].mxu0 %vm51_vm0, %v49_v2  ;;  %v494_v8 = vpack.c.bf16 %v230_v6, %v229_v5  ;;  %v232_v9 = vld [vmem:[%s734_s4 + $0x18] sm:$0xff]  ;;  %v233_v11 = vld [vmem:[%s734_s4 + $0x20] sm:$0xff]  ;;  %v234_v12 = vld [vmem:[%s734_s4 + $0x28] sm:$0xff] }
   0x7   :  { %455 = vmatpush3.msra.mxu0 %v140_v3  ;;  %v500_v10 = vpack.c.bf16 %v232_v9, %v231_v7  ;;  %v506_v13 = vpack.c.bf16 %v234_v12, %v233_v11  ;;  %v235_v14 = vld [vmem:[%s734_s4 + $0x30] sm:$0xff]  ;;  %v236_v15 = vld [vmem:[%s734_s4 + $0x38] sm:$0xff]  ;;  %v237_v17 = vld [vmem:[%s734_s4 + $0x40] sm:$0xff] }
   0x8   :  { %496 = vmatprep.subr.msk.bf16.mxu1 %vm623_vm1, %v494_v8  ;;  %v512_v16 = vpack.c.bf16 %v236_v15, %v235_v14  ;;  %v238_v18 = vld [vmem:[%s734_s4 + $0x48] sm:$0xff]  ;;  %v239_v20 = vld [vmem:[%s734_s4 + $0x50] sm:$0xff]  ;;  %v240_v21 = vld [vmem:[%s734_s4 + $0x58] sm:$0xff] }
   0x9   :  { %499 = vmatpush3.bf16.xpose.msk.msra.mxu1 %vm623_vm1, %v494_v8  ;;  %v518_v19 = vpack.c.bf16 %v238_v18, %v237_v17  ;;  %v524_v22 = vpack.c.bf16 %v240_v21, %v239_v20  ;;  %v241_v23 = vld [vmem:[%s734_s4 + $0x60] sm:$0xff]  ;;  %v242_v24 = vld [vmem:[%s734_s4 + $0x68] sm:$0xff]  ;;  %v243_v32 = vld [vmem:[%s734_s4 + $0x70] sm:$0xff] }
   0xa   :  { %502 = vmatprep.subr.msk.bf16.mxu1 %vm623_vm1, %v500_v10  ;;  %v530_v25 = vpack.c.bf16 %v242_v24, %v241_v23  ;;  %v136_v26 = vld [vmem:[%s730_s0] sm:$0xff]  ;;  %v137_v28 = vld [vmem:[%s730_s0 + $0x8] sm:$0xff]  ;;  %v244_v33 = vld [vmem:[%s734_s4 + $0x78] sm:$0xff]  ;;  %s569_s0 = smov [#allocation3]  }
   0xb   :  { %v536_v34 = vpack.c.bf16 %v244_v33, %v243_v32  ;;  %s385_s4 = sshll.u32 %s569_s0, 4  ;;  %s386_s4 = int_to_ptr.vmem [resolvable:$true] %s385_s4 }
   0xc   :  { %s545_s6 = scalar_lea.vmem %s386_s4, 256  ;;  %p550_p1 = scmp.lt.s32.totalorder %s386_s4, %s386_s4 }
   0xd   :  { %p546_p0 = scmp.ne.s32.totalorder %s386_s4, %s545_s6  ;;  %p551_p2 = scmp.lt.s32.totalorder %s545_s6, %s545_s6 }
   0xf   :  { %p552_p3 = por %p551_p2, %p550_p1 }
  0x11   :  { %505 = vmatpush3.bf16.xpose.msk.msra.mxu1 %vm623_vm1, %v500_v10  ;;  %p553_p4 = pnand %p552_p3, %p546_p0 }
  0x12   :  { %508 = vmatprep.subr.msk.bf16.mxu1 %vm623_vm1, %v506_v13 }
  0x19   :  { %511 = vmatpush3.bf16.xpose.msk.msra.mxu1 %vm623_vm1, %v506_v13 }
  0x1a   :  { %514 = vmatprep.subr.msk.bf16.mxu1 %vm623_vm1, %v512_v16 }
  0x21   :  { %517 = vmatpush3.bf16.xpose.msk.msra.mxu1 %vm623_vm1, %v512_v16 }
  0x22   :  { %520 = vmatprep.subr.msk.bf16.mxu1 %vm623_vm1, %v518_v19 }
  0x29   :  { %523 = vmatpush3.bf16.xpose.msk.msra.mxu1 %vm623_vm1, %v518_v19 }
  0x2a   :  { %526 = vmatprep.subr.msk.bf16.mxu1 %vm623_vm1, %v524_v22 }
  0x31   :  { %529 = vmatpush3.bf16.xpose.msk.msra.mxu1 %vm623_vm1, %v524_v22 }
  0x32   :  { %532 = vmatprep.subr.msk.bf16.mxu1 %vm623_vm1, %v530_v25 }
  0x39   :  { %535 = vmatpush3.bf16.xpose.msk.msra.mxu1 %vm623_vm1, %v530_v25 }
  0x3a   :  { %538 = vmatprep.subr.msk.bf16.mxu1 %vm623_vm1, %v536_v34 }
  0x41   :  { %541 = vmatpush3.bf16.xpose.msk.msra.mxu1 %vm623_vm1, %v536_v34 }
  0xd9   :  { %v453_v27 = vpop.f32.mrb[0].mxu0 }
  0xda   :  { %v127_v29 = vpop.f32.mrb[1].mxu0  ;;  %v139_v31 = vmul.f32 %v453_v27, %v137_v28 }
  0xdb   :  { %v138_v30 = vmul.f32 %v136_v26, %v127_v29 }
  0xdd   :  { %456 = vmatprep.mubr.msk.f32.mxu0 %vm141_vm2, %v138_v30 }
  0xde   :  { %457 = vmatmul.mubr.msk.f32.vlgmr.msra.gmra.mrb[2].mxu0 %vm141_vm2, %v139_v31 }
 0x1b1   :  { %v458_v35 = vpop.f32.mrb[2].mxu0 }
 0x1b2   :  { %v224_v36 = vadd.f32 %v458_v35, %v49_v2  ;;  %v214_v37 = vpop.f32.mrb[3].mxu0 }
 0x1b3   :  { %v223_v38 = vadd.f32 %v214_v37, %v608_v1 }
 0x1b4   :  { %226 = vst.msk [vmem:[#allocation2 + $0x8] sm:$0xff] %vm51_vm0, %v224_v36 }
 0x1b5   :  { %225 = vst.msk [vmem:[#allocation2] sm:$0xff] %vm51_vm0, %v223_v38 }
 0x1bb   :  { %v228_v40 = vld [vmem:[#allocation2 + $0x8] sm:$0xff] }
 0x1bc   :  { %v227_v39 = vld [vmem:[#allocation2] sm:$0xff] }
 0x1bd   :  { %491 = vmatprep.mubr.msk.f32.mxu1 %vm51_vm0, %v227_v39 }
 0x1be   :  { %492 = vmatmul.mubr.msk.f32.vlgmr.msra.gmra.mrb[0].mxu1 %vm51_vm0, %v228_v40 }
 0x291   :  { %v493_v41 = vpop.f32.mrb[0].mxu1 }
 0x292   :  { %376 = vst [vmem:[#allocation3 + $0x8] sm:$0xff] %v493_v41  ;;  %v366_v42 = vpop.f32.mrb[1].mxu1 }
 0x293   :  { %375 = vst [vmem:[#allocation3] sm:$0xff] %v366_v42 }
 0x294   :  { %556 = shalt.err (!%p553_p4)
}
 0x295   :  { %s557_s9 = scalar_lea.hbm %s735_s5, 256 }
 0x296   :  { %p558_p5 = scmp.ne.s32.totalorder %s735_s5, %s557_s9  ;;  %p561_p6 = scmp.lt.u32.totalorder %s557_s9, %s735_s5 }
 0x298   :  { %p563_p7 = pnand %p561_p6, %p558_p5 }
 0x29a   :  { %566 = shalt.err (!%p563_p7)
}
 0x29b   :  { %s570_s14 = smov 128   ;;  %s571_s15 = smov 8  }
 0x29c   :  { %391 = dma.vmem_to_hbm [thread:$0]  %s386_s4, 256, %s735_s5, [#allocation4], %s570_s14, %s570_s14, %s571_s15  }
 0x29d   :  { %567 = dma.done.wait [#allocation4], 256  }
 0x29e   :  { %568 = vsyncadd [#allocation4], 4294967040 }
 0x29f   :  { %395 = vsyncpa [#allocation4], 1 }

</bundles_post_ra>
